<compile_context>
chip_gen: v7x
topology: tpu7x:2x2x1
jax: 0.10.0
libtpu: 0.0.40
codegen_flags: <defaults>
</compile_context>

<pallas_src>
import functools

import jax
import jax.numpy as jnp
from jax import lax
from jax.experimental import pallas as pl
from jax.experimental.pallas import tpu as pltpu

_LANE = 128


def _coxph_loss_kernel(risk_ref, cens_ref, tri_in_ref, tri_ex_ref, inv_ref,
                       out_ref, num_acc, cnt_acc, carry,
                       *, rows_total, needs_mask):
    # grid = (n_tiles,); sequential walk over the sample axis (lane-major).
    i = pl.program_id(0)
    n_tiles = pl.num_programs(0)
    br = risk_ref.shape[0]

    @pl.when(i == 0)
    def _init():
        carry[0] = 0.0                       # running sum of exp(riskmax)
        num_acc[...] = jnp.zeros_like(num_acc)
        cnt_acc[...] = jnp.zeros_like(cnt_acc)

    x = risk_ref[...]                        # (br, 128) f32, row-major samples
    c = cens_ref[...]                        # (br, 128) f32

    if needs_mask:
        # Only emitted when rows_total % br != 0: neutralize the out-of-bounds
        # (garbage) rows of the partial last block.  Use where (not multiply)
        # so NaN/Inf garbage cannot leak through.
        row_id = lax.broadcasted_iota(jnp.int32, (br, _LANE), 0) + i * br
        valid = row_id < rows_total
        x = jnp.where(valid, x, 0.0)
        c = jnp.where(valid, c, 0.0)

    # F.normalize(risk, p=2, dim=0): scalar inv_norm precomputed in the
    # wrapper, vector multiply here (no vector divide).
    riskmax = x * inv_ref[0, 0]
    e = jnp.exp(riskmax)

    # Per-row totals first (one XLU lane reduce), then the scalar carry update
    # as early as possible so the loop-carried SMEM chain stays short.
    row_tot = jnp.sum(e, axis=1, keepdims=True)          # (br, 1)
    prev_carry = carry[0]
    carry[0] = prev_carry + jnp.sum(row_tot)

    # In-row (lane axis) inclusive prefix sum on the MXU:
    #   cum_row[r, j] = sum_{k <= j} e[r, k]
    cum_row = jnp.dot(e, tri_in_ref[...], preferred_element_type=jnp.float32)

    # Cross-row (sublane axis) exclusive prefix of the row totals, broadcast
    # across lanes directly by the matmul (shapes stay (.,128)-friendly; MXU
    # has large slack here so the extra MACs are free):
    #   row_excl[r, :] = sum_{s < r} row_tot[s]
    row_excl = jnp.dot(tri_ex_ref[...],
                       jnp.broadcast_to(row_tot, (br, _LANE)),
                       preferred_element_type=jnp.float32)

    # Full inclusive prefix = carry from previous tiles + cross-row + in-row.
    log_cum = jnp.log(prev_carry + row_excl + cum_row)    # cum > 0 always

    contrib = c * (riskmax - log_cum)                      # (br, 128)
    nz = (c != 0.0).astype(jnp.float32)

    # Fixed-size vector accumulators: fold (br,128) -> (8,128) with VPU adds.
    num_acc[...] += jnp.sum(contrib.reshape(br // 8, 8, _LANE), axis=0)
    cnt_acc[...] += jnp.sum(nz.reshape(br // 8, 8, _LANE), axis=0)

    @pl.when(i == n_tiles - 1)
    def _emit():
        # Single cross-lane reduction + scalar divide, once per call.
        # Matches PyTorch: inf/nan if censors are all zero.
        out_ref[0, 0] = -jnp.sum(num_acc[...]) / jnp.sum(cnt_acc[...])


def coxph_loss(risk, phase, censors, *, block_rows=256):
    """risk: (N, 1) f32, phase: unused, censors: (N,) f32. Returns scalar f32.

    block_rows * 128 samples are processed per grid step.  Suggested sweep:
    64-128 on v5e (scoped-VMEM / store-slot limits), 256+ on v6e/v7x.
    """
    del phase                                   # unused by the forward pass
    block_rows = max(8, block_rows - block_rows % 8)

    risk_flat = jnp.asarray(risk, jnp.float32).reshape(-1)
    cens_flat = jnp.asarray(censors, jnp.float32).reshape(-1)
    n = risk_flat.shape[0]

    # L2-normalization scale as a fused XLA reduction (replaces kernel pass 0).
    # F.normalize(p=2, dim=0) == risk / max(||risk||, 1e-12) == risk * inv_norm.
    sumsq = jnp.sum(risk_flat * risk_flat)
    inv_norm = lax.rsqrt(jnp.maximum(sumsq, jnp.float32(1e-24))).reshape(1, 1)

    # Pad only to a multiple of 8*128 (sublane alignment).  The zero padding
    # is loss-neutral: it sits after every real sample in the cumsum order and
    # its censors are zero.
    n_pad = pl.cdiv(n, 8 * _LANE) * (8 * _LANE)
    risk2d = jnp.pad(risk_flat, (0, n_pad - n)).reshape(-1, _LANE)
    cens2d = jnp.pad(cens_flat, (0, n_pad - n)).reshape(-1, _LANE)
    rows = n_pad // _LANE                        # always a multiple of 8

    br = min(block_rows, rows)                   # multiple of 8 (or == rows)
    n_tiles = pl.cdiv(rows, br)
    needs_mask = (rows % br) != 0                # static: partial last block?

    # Hoisted scan constants (fetched once, VMEM-resident across grid steps).
    tri_incl = jnp.triu(jnp.ones((_LANE, _LANE), jnp.float32))        # [k <= j]
    tri_excl = jnp.tril(jnp.ones((br, br), jnp.float32), k=-1)        # [s <  r]

    kernel = functools.partial(_coxph_loss_kernel,
                               rows_total=rows, needs_mask=needs_mask)

    out = pl.pallas_call(
        kernel,
        out_shape=jax.ShapeDtypeStruct((1, 1), jnp.float32),
        grid_spec=pltpu.PrefetchScalarGridSpec(
            num_scalar_prefetch=0,
            grid=(n_tiles,),
            in_specs=[
                pl.BlockSpec((br, _LANE), lambda i: (i, 0)),           # risk
                pl.BlockSpec((br, _LANE), lambda i: (i, 0)),           # censors
                pl.BlockSpec((_LANE, _LANE), lambda i: (0, 0)),        # tri_incl
                pl.BlockSpec((br, br), lambda i: (0, 0)),              # tri_excl
                pl.BlockSpec(memory_space=pltpu.MemorySpace.SMEM),     # inv_norm
            ],
            out_specs=pl.BlockSpec(memory_space=pltpu.MemorySpace.SMEM),
            scratch_shapes=[
                pltpu.VMEM((8, _LANE), jnp.float32),   # loss numerator acc
                pltpu.VMEM((8, _LANE), jnp.float32),   # nonzero-censor count acc
                pltpu.SMEM((1,), jnp.float32),         # running sum(exp) carry
            ],
        ),
        compiler_params=pltpu.CompilerParams(
            dimension_semantics=("arbitrary",)),
    )(risk2d, cens2d, tri_incl, tri_excl, inv_norm)
    return out[0, 0]


def _reference(risk, censors):
    """Pure-JAX reference mirroring the PyTorch forward."""
    riskmax = risk / jnp.maximum(
        jnp.linalg.norm(risk, axis=0, keepdims=True), 1e-12)
    log_risk = jnp.log(jnp.cumsum(jnp.exp(riskmax), axis=0))
    ulh = riskmax - log_risk
    clh = ulh * censors.reshape(-1, 1)
    return -jnp.sum(clh) / jnp.count_nonzero(censors).astype(jnp.float32)


if __name__ == "__main__":
    key = jax.random.PRNGKey(0)
    k1, k2, k3 = jax.random.split(key, 3)

    # Small shapes implied by the module: risk (N, 1), censors (N,).
    N = 8
    risk = jax.random.normal(k1, (N, 1), dtype=jnp.float32)
    phase = jax.random.normal(k2, (N,), dtype=jnp.float32)    # unused by the loss
    censors = jax.random.bernoulli(k3, 0.6, (N,)).astype(jnp.float32)
    censors = censors.at[0].set(1.0)   # guarantee >= 1 event (nonzero divisor)

    loss = coxph_loss(risk, phase, censors)
    jax.block_until_ready(loss)
    ref = _reference(risk, censors)
    assert jnp.allclose(loss, ref, rtol=1e-5, atol=1e-5), (loss, ref)

    # Larger run with the default (big) tile: single block, no mask.
    k4, k5 = jax.random.split(key)
    N2 = 2500
    risk2 = jax.random.normal(k4, (N2, 1), dtype=jnp.float32)
    censors2 = jax.random.bernoulli(k5, 0.5, (N2,)).astype(jnp.float32)
    censors2 = censors2.at[0].set(1.0)
    ref2 = _reference(risk2, censors2)

    loss2 = coxph_loss(risk2, phase, censors2)
    jax.block_until_ready(loss2)
    assert jnp.allclose(loss2, ref2, rtol=1e-5, atol=1e-5), (loss2, ref2)

    # Multi-tile run: exercises the cross-tile exp-prefix carry (3 grid steps).
    loss3 = coxph_loss(risk2, phase, censors2, block_rows=8)
    jax.block_until_ready(loss3)
    assert jnp.allclose(loss3, ref2, rtol=1e-5, atol=1e-5), (loss3, ref2)

    # Partial last block: exercises the in-kernel OOB row mask (24 rows, BR=16).
    loss4 = coxph_loss(risk2, phase, censors2, block_rows=16)
    jax.block_until_ready(loss4)
    assert jnp.allclose(loss4, ref2, rtol=1e-5, atol=1e-5), (loss4, ref2)

    print("KERNEL_OK")
</pallas_src>

<mosaic_0001>
module attributes {stable_mosaic.version = 11 : i64} {
  func.func @_coxph_loss_kernel(%arg0: i32, %arg1: memref<8x128xf32, #tpu.memory_space<vmem>>, %arg2: memref<8x128xf32, #tpu.memory_space<vmem>>, %arg3: memref<128x128xf32, #tpu.memory_space<vmem>>, %arg4: memref<8x8xf32, #tpu.memory_space<vmem>>, %arg5: memref<1x1xf32, #tpu.memory_space<smem>>, %arg6: memref<1x1xf32, #tpu.memory_space<smem>>, %arg7: memref<8x128xf32, #tpu.memory_space<vmem>>, %arg8: memref<8x128xf32, #tpu.memory_space<vmem>>, %arg9: memref<1xf32, #tpu.memory_space<smem>>) attributes {dimension_semantics = [#tpu.dimension_semantics<arbitrary>], iteration_bounds = array<i64: 1>, scalar_prefetch = 0 : i64, scratch_operands = 3 : i64, tpu.core_type = #tpu.core_type<tc>, window_params = [{transform_indices = @transform_0, window_bounds = array<i64: 8, 128>}, {transform_indices = @transform_1, window_bounds = array<i64: 8, 128>}, {pipeline_mode = #tpu.pipeline_mode<synchronous>, transform_indices = @transform_2, window_bounds = array<i64: 128, 128>}, {pipeline_mode = #tpu.pipeline_mode<synchronous>, transform_indices = @transform_3, window_bounds = array<i64: 8, 8>}, {transform_indices = @transform_4, window_bounds = array<i64: 1, 1>}, {transform_indices = @transform_5, window_bounds = array<i64: 1, 1>}]} {
    %c0_i32 = arith.constant 0 : i32
    %0 = arith.cmpi eq, %arg0, %c0_i32 : i32
    %1 = arith.extui %0 : i1 to i32
    %c0_i32_0 = arith.constant 0 : i32
    %2 = arith.cmpi ne, %1, %c0_i32_0 : i32
    scf.if %2 {
      %cst_28 = arith.constant 0.000000e+00 : f32
      %c0_29 = arith.constant 0 : index
      %47 = memref.load %arg9[%c0_29] : memref<1xf32, #tpu.memory_space<smem>>
      memref.store %cst_28, %arg9[%c0_29] : memref<1xf32, #tpu.memory_space<smem>>
      %cst_30 = arith.constant 0.000000e+00 : f32
      %48 = vector.broadcast %cst_30 : f32 to vector<8x128xf32>
      %c0_31 = arith.constant 0 : index
      %c0_32 = arith.constant 0 : index
      %49 = vector.load %arg7[%c0_31, %c0_32] : memref<8x128xf32, #tpu.memory_space<vmem>>, vector<8x128xf32>
      tpu.vector_store %arg7[%c0_31, %c0_32], %48 {strides = array<i32>} : memref<8x128xf32, #tpu.memory_space<vmem>>, vector<8x128xf32>,
      %cst_33 = arith.constant 0.000000e+00 : f32
      %50 = vector.broadcast %cst_33 : f32 to vector<8x128xf32>
      %c0_34 = arith.constant 0 : index
      %c0_35 = arith.constant 0 : index
      %51 = vector.load %arg8[%c0_34, %c0_35] : memref<8x128xf32, #tpu.memory_space<vmem>>, vector<8x128xf32>
      tpu.vector_store %arg8[%c0_34, %c0_35], %50 {strides = array<i32>} : memref<8x128xf32, #tpu.memory_space<vmem>>, vector<8x128xf32>,
    } else {
    }
    %c0 = arith.constant 0 : index
    %c0_1 = arith.constant 0 : index
    %3 = vector.load %arg1[%c0, %c0_1] : memref<8x128xf32, #tpu.memory_space<vmem>>, vector<8x128xf32>
    %c0_2 = arith.constant 0 : index
    %c0_3 = arith.constant 0 : index
    %4 = vector.load %arg2[%c0_2, %c0_3] : memref<8x128xf32, #tpu.memory_space<vmem>>, vector<8x128xf32>
    %c0_4 = arith.constant 0 : index
    %c0_5 = arith.constant 0 : index
    %5 = memref.load %arg5[%c0_4, %c0_5] : memref<1x1xf32, #tpu.memory_space<smem>>
    %6 = vector.broadcast %5 : f32 to vector<8x128xf32>
    %7 = arith.mulf %3, %6 : vector<8x128xf32>
    %8 = math.exp %7 : vector<8x128xf32>
    %cst = arith.constant dense<0.000000e+00> : vector<8xf32>
    %9 = vector.multi_reduction <add>, %8, %cst [1] : vector<8x128xf32> to vector<8xf32>
    %10 = vector.shape_cast %9 : vector<8xf32> to vector<8x1xf32>
    %c0_6 = arith.constant 0 : index
    %11 = memref.load %arg9[%c0_6] : memref<1xf32, #tpu.memory_space<smem>>
    %12 = vector.shape_cast %10 : vector<8x1xf32> to vector<1x8x1xf32>
    %cst_7 = arith.constant dense<0.000000e+00> : vector<1xf32>
    %13 = vector.multi_reduction <add>, %12, %cst_7 [1, 2] : vector<1x8x1xf32> to vector<1xf32>
    %14 = vector.shape_cast %13 : vector<1xf32> to vector<1x1x1xf32>
    %15 = vector.extract %14[0, 0, 0] : f32 from vector<1x1x1xf32>
    %16 = arith.addf %11, %15 : f32
    %c0_8 = arith.constant 0 : index
    %17 = memref.load %arg9[%c0_8] : memref<1xf32, #tpu.memory_space<smem>>
    memref.store %16, %arg9[%c0_8] : memref<1xf32, #tpu.memory_space<smem>>
    %c0_9 = arith.constant 0 : index
    %c0_10 = arith.constant 0 : index
    %18 = vector.load %arg3[%c0_9, %c0_10] : memref<128x128xf32, #tpu.memory_space<vmem>>, vector<128x128xf32>
    %cst_11 = arith.constant dense<0.000000e+00> : vector<8x128xf32>
    %19 = tpu.matmul %8, %18, %cst_11 {dimension_numbers = #tpu.dot_dimension_numbers<[1], [0], [0], [1], [0, 0, 1, 1], [], []>} : vector<8x128xf32>, vector<128x128xf32>, vector<8x128xf32> -> vector<8x128xf32>
    %c0_12 = arith.constant 0 : index
    %c0_13 = arith.constant 0 : index
    %20 = vector.load %arg4[%c0_12, %c0_13] : memref<8x8xf32, #tpu.memory_space<vmem>>, vector<8x8xf32>
    %21 = vector.shape_cast %10 : vector<8x1xf32> to vector<8x1xf32>
    %22 = vector.broadcast %21 : vector<8x1xf32> to vector<8x128xf32>
    %cst_14 = arith.constant dense<0.000000e+00> : vector<8x128xf32>
    %23 = tpu.matmul %20, %22, %cst_14 {dimension_numbers = #tpu.dot_dimension_numbers<[1], [0], [0], [1], [0, 0, 1, 1], [], []>} : vector<8x8xf32>, vector<8x128xf32>, vector<8x128xf32> -> vector<8x128xf32>
    %24 = vector.broadcast %11 : f32 to vector<8x128xf32>
    %25 = arith.addf %24, %23 : vector<8x128xf32>
    %26 = arith.addf %25, %19 : vector<8x128xf32>
    %27 = math.log %26 : vector<8x128xf32>
    %28 = arith.subf %7, %27 : vector<8x128xf32>
    %29 = arith.mulf %4, %28 : vector<8x128xf32>
    %cst_15 = arith.constant 0.000000e+00 : f32
    %30 = vector.broadcast %cst_15 : f32 to vector<8x128xf32>
    %31 = arith.cmpf one, %4, %30 : vector<8x128xf32>
    %32 = arith.extui %31 : vector<8x128xi1> to vector<8x128xi32>
    %33 = arith.sitofp %32 : vector<8x128xi32> to vector<8x128xf32>
    %c0_16 = arith.constant 0 : index
    %c0_17 = arith.constant 0 : index
    %34 = vector.load %arg7[%c0_16, %c0_17] : memref<8x128xf32, #tpu.memory_space<vmem>>, vector<8x128xf32>
    %35 = vector.shape_cast %29 : vector<8x128xf32> to vector<1x8x128xf32>
    %cst_18 = arith.constant dense<0.000000e+00> : vector<8x128xf32>
    %36 = vector.multi_reduction <add>, %35, %cst_18 [0] : vector<1x8x128xf32> to vector<8x128xf32>
    %37 = arith.addf %34, %36 : vector<8x128xf32>
    %c0_19 = arith.constant 0 : index
    %c0_20 = arith.constant 0 : index
    %38 = vector.load %arg7[%c0_19, %c0_20] : memref<8x128xf32, #tpu.memory_space<vmem>>, vector<8x128xf32>
    tpu.vector_store %arg7[%c0_19, %c0_20], %37 {strides = array<i32>} : memref<8x128xf32, #tpu.memory_space<vmem>>, vector<8x128xf32>,
    %c0_21 = arith.constant 0 : index
    %c0_22 = arith.constant 0 : index
    %39 = vector.load %arg8[%c0_21, %c0_22] : memref<8x128xf32, #tpu.memory_space<vmem>>, vector<8x128xf32>
    %40 = vector.shape_cast %33 : vector<8x128xf32> to vector<1x8x128xf32>
    %cst_23 = arith.constant dense<0.000000e+00> : vector<8x128xf32>
    %41 = vector.multi_reduction <add>, %40, %cst_23 [0] : vector<1x8x128xf32> to vector<8x128xf32>
    %42 = arith.addf %39, %41 : vector<8x128xf32>
    %c0_24 = arith.constant 0 : index
    %c0_25 = arith.constant 0 : index
    %43 = vector.load %arg8[%c0_24, %c0_25] : memref<8x128xf32, #tpu.memory_space<vmem>>, vector<8x128xf32>
    tpu.vector_store %arg8[%c0_24, %c0_25], %42 {strides = array<i32>} : memref<8x128xf32, #tpu.memory_space<vmem>>, vector<8x128xf32>,
    %c0_i32_26 = arith.constant 0 : i32
    %44 = arith.cmpi eq, %arg0, %c0_i32_26 : i32
    %45 = arith.extui %44 : i1 to i32
    %c0_i32_27 = arith.constant 0 : i32
    %46 = arith.cmpi ne, %45, %c0_i32_27 : i32
    scf.if %46 {
      %c0_28 = arith.constant 0 : index
      %c0_29 = arith.constant 0 : index
      %47 = vector.load %arg7[%c0_28, %c0_29] : memref<8x128xf32, #tpu.memory_space<vmem>>, vector<8x128xf32>
      %48 = vector.shape_cast %47 : vector<8x128xf32> to vector<1x8x128xf32>
      %cst_30 = arith.constant dense<0.000000e+00> : vector<1xf32>
      %49 = vector.multi_reduction <add>, %48, %cst_30 [1, 2] : vector<1x8x128xf32> to vector<1xf32>
      %50 = vector.shape_cast %49 : vector<1xf32> to vector<1x1x1xf32>
      %51 = vector.extract %50[0, 0, 0] : f32 from vector<1x1x1xf32>
      %cst_31 = arith.constant 0.000000e+00 : f32
      %52 = arith.subf %cst_31, %51 : f32
      %c0_32 = arith.constant 0 : index
      %c0_33 = arith.constant 0 : index
      %53 = vector.load %arg8[%c0_32, %c0_33] : memref<8x128xf32, #tpu.memory_space<vmem>>, vector<8x128xf32>
      %54 = vector.shape_cast %53 : vector<8x128xf32> to vector<1x8x128xf32>
      %cst_34 = arith.constant dense<0.000000e+00> : vector<1xf32>
      %55 = vector.multi_reduction <add>, %54, %cst_34 [1, 2] : vector<1x8x128xf32> to vector<1xf32>
      %56 = vector.shape_cast %55 : vector<1xf32> to vector<1x1x1xf32>
      %57 = vector.extract %56[0, 0, 0] : f32 from vector<1x1x1xf32>
      %58 = arith.divf %52, %57 : f32
      %c0_35 = arith.constant 0 : index
      %c0_36 = arith.constant 0 : index
      %59 = memref.load %arg6[%c0_35, %c0_36] : memref<1x1xf32, #tpu.memory_space<smem>>
      memref.store %58, %arg6[%c0_35, %c0_36] : memref<1x1xf32, #tpu.memory_space<smem>>
    } else {
    }
    return
  }
  func.func @transform_0(%arg0: i32) -> (i32, i32) {
    %c0_i32 = arith.constant 0 : i32
    %c0_i32_0 = arith.constant 0 : i32
    return %arg0, %c0_i32 : i32, i32
  }
  func.func @transform_1(%arg0: i32) -> (i32, i32) {
    %c0_i32 = arith.constant 0 : i32
    %c0_i32_0 = arith.constant 0 : i32
    return %arg0, %c0_i32 : i32, i32
  }
  func.func @transform_2(%arg0: i32) -> (i32, i32) {
    %c0_i32 = arith.constant 0 : i32
    %c0_i32_0 = arith.constant 0 : i32
    %c0_i32_1 = arith.constant 0 : i32
    return %c0_i32, %c0_i32_0 : i32, i32
  }
  func.func @transform_3(%arg0: i32) -> (i32, i32) {
    %c0_i32 = arith.constant 0 : i32
    %c0_i32_0 = arith.constant 0 : i32
    %c0_i32_1 = arith.constant 0 : i32
    return %c0_i32, %c0_i32_0 : i32, i32
  }
  func.func @transform_4(%arg0: i32) -> (i32, i32) {
    %c0_i32 = arith.constant 0 : i32
    %c0_i32_0 = arith.constant 0 : i32
    %c0_i32_1 = arith.constant 0 : i32
    return %c0_i32, %c0_i32_0 : i32, i32
  }
  func.func @transform_5(%arg0: i32) -> (i32, i32) {
    %c0_i32 = arith.constant 0 : i32
    %c0_i32_0 = arith.constant 0 : i32
    %c0_i32_1 = arith.constant 0 : i32
    return %c0_i32, %c0_i32_0 : i32, i32
  }
}

</mosaic_0001>

<bundles_post_ra>
// kernel: tpu_custom_call.1
= control target key start
LH: loop header
LB: loop body
LE: loop exit
PB: predicated region body
PF: predicated region fallthrough
CT: control target
= control target key end

     0   :  { %11 = vsyncpa [#allocation7], 0  ;;  %s597_s0 = inlined_call_operand.hbm [shape: f32[8,128], index: 0, kind: input, shape index: {}]   ;;  %s598_s1 = inlined_call_operand.hbm [shape: f32[8,128], index: 1, kind: input, shape index: {}]   ;;  %s599_s2 = inlined_call_operand.hbm [shape: f32[128,128], index: 2, kind: input, shape index: {}]   ;;  %s600_s3 = inlined_call_operand.vmem [shape: f32[8,8], index: 3, kind: input, shape index: {}]   ;;  %s601_s4 = inlined_call_operand.<no memory space> [shape: f32[1,1], index: 4, kind: input, shape index: {}]   ;;  %s602_s5 = inlined_call_operand.hbm [shape: f32[1,1], index: 5, kind: output, shape index: {}]  }
   0x1   :  { %12 = vsyncpa [#allocation10], 0 }
   0x2   :  { %13 = vsyncpa [#allocation8], 0  ;;  %s504_s18 = smov [#allocation9]   ;;  %s505_s20 = smov [#allocation6]  }
   0x3   :  { %s30_s19 = sshll.u32 %s504_s18, 4  ;;  %s20_s21 = sshll.u32 %s505_s20, 4  ;;  %s31_s19 = int_to_ptr.vmem [resolvable:$true] %s30_s19  ;;  %s21_s21 = int_to_ptr.vmem [resolvable:$true] %s20_s21 }
   0x4   :  { %s422_s24 = scalar_lea.hbm %s598_s1, 128 }
   0x5   :  { %p423_p0 = scmp.ne.s32.totalorder %s598_s1, %s422_s24  ;;  %p426_p1 = scmp.lt.u32.totalorder %s422_s24, %s598_s1 }
   0x7   :  { %p428_p2 = pnand %p426_p1, %p423_p0 }
   0x9   :  { %431 = shalt.err (!%p428_p2)
}
   0xa   :  { %s432_s29 = scalar_lea.vmem %s31_s19, 128  ;;  %p437_p4 = scmp.lt.s32.totalorder %s31_s19, %s31_s19 }
   0xb   :  { %p433_p3 = scmp.ne.s32.totalorder %s31_s19, %s432_s29  ;;  %p438_p5 = scmp.lt.s32.totalorder %s432_s29, %s432_s29 }
   0xd   :  { %p439_p6 = por %p438_p5, %p437_p4 }
   0xf   :  { %p440_p7 = pnand %p439_p6, %p433_p3 }
  0x11   :  { %443 = shalt.err (!%p440_p7)
}
  0x12   :  { %33 = dma.hbm_to_vmem [thread:$0]  %s598_s1, 128, %s31_s19, [#allocation10]  }
  0x13   :  { %s444_s9 = scalar_lea.hbm %s597_s0, 128 }
  0x14   :  { %p445_p8 = scmp.ne.s32.totalorder %s597_s0, %s444_s9  ;;  %p448_p9 = scmp.lt.u32.totalorder %s444_s9, %s597_s0 }
  0x16   :  { %p450_p10 = pnand %p448_p9, %p445_p8 }
  0x18   :  { %453 = shalt.err (!%p450_p10)
}
  0x19   :  { %s454_s14 = scalar_lea.vmem %s21_s21, 128  ;;  %p459_p12 = scmp.lt.s32.totalorder %s21_s21, %s21_s21 }
  0x1a   :  { %p455_p11 = scmp.ne.s32.totalorder %s21_s21, %s454_s14  ;;  %p460_p13 = scmp.lt.s32.totalorder %s454_s14, %s454_s14 }
  0x1c   :  { %p461_p0 = por %p460_p13, %p459_p12 }
  0x1e   :  { %p462_p1 = pnand %p461_p0, %p455_p11 }
  0x20   :  { %465 = shalt.err (!%p462_p1)
}
  0x21   :  { %23 = dma.hbm_to_vmem [thread:$0]  %s597_s0, 128, %s21_s21, [#allocation7]  }
  0x22   :  { %s506_s16 = smov [#allocation11]   ;;  %s466_s20 = scalar_lea.hbm %s599_s2, 2048 }
  0x23   :  { %s39_s17 = sshll.u32 %s506_s16, 4  ;;  %p467_p2 = scmp.ne.s32.totalorder %s599_s2, %s466_s20  ;;  %s40_s17 = int_to_ptr.vmem [resolvable:$true] %s39_s17 }
  0x24   :  { %p470_p3 = scmp.lt.u32.totalorder %s466_s20, %s599_s2 }
  0x26   :  { %p472_p4 = pnand %p470_p3, %p467_p2 }
  0x28   :  { %475 = shalt.err (!%p472_p4)
}
  0x29   :  { %s476_s26 = scalar_lea.vmem %s40_s17, 2048  ;;  %p481_p6 = scmp.lt.s32.totalorder %s40_s17, %s40_s17 }
  0x2a   :  { %p477_p5 = scmp.ne.s32.totalorder %s40_s17, %s476_s26  ;;  %p482_p7 = scmp.lt.s32.totalorder %s476_s26, %s476_s26 }
  0x2c   :  { %p483_p8 = por %p482_p7, %p481_p6 }
  0x2e   :  { %p484_p9 = pnand %p483_p8, %p477_p5 }
  0x30   :  { %487 = shalt.err (!%p484_p9)
}
  0x31   :  { %s507_s0 = smov 128   ;;  %s508_s21 = smov 8  }
  0x32   :  { %45 = dma.hbm_to_vmem [thread:$0]  %s599_s2, 2048, %s40_s17, [#allocation10], %s507_s0, %s507_s0, %s508_s21  }
  0x33   :  { %498 = dma.done.wait [#allocation7], 128  }
  0x34   :  { %499 = vsyncadd [#allocation7], 4294967168 }
  0x35   :  { %500 = dma.done.wait [#allocation10], 2176  }
  0x36   :  { %501 = vsyncadd [#allocation10], 4294965120  ;;  %v509_v0 = vmov 0.0|0.0   ;;  %vm510_vm0 = vmmov 0   ;;  %v511_v1 = vmov 0.0   ;;  %v70_v2 = vstv %s601_s4  ;;  %v67_v3 = vld [vmem:[#allocation6] sm:$0xff] }
  0x37   :  { %376 = vmatprep.subr.bf16.mxu1 %v509_v0  ;;  %368 = vmatprep.mubr.msk.f32.mxu1 %vm510_vm0, %v511_v1  ;;  %v91_v4 = vld [vmem:[#allocation11] sm:$0xff]  ;;  %v92_v5 = vld [vmem:[#allocation11 + $0x8] sm:$0xff]  ;;  %v71_v6 = vmul.f32 %v70_v2, %v67_v3  ;;  %v93_v8 = vld [vmem:[#allocation11 + $0x10] sm:$0xff]  ;;  %vm178_vm1 = vcmask 64512   ;;  %s488_s12 = scalar_lea.hbm %s602_s5, 16 }
  0x38   :  { %371 = vmatprep.subr.mxu0 %v511_v1  ;;  %373 = vmatprep.mubr.msk.f32.mxu0 %vm510_vm0, %v511_v1  ;;  %v377_v7 = vpack.c.bf16 %v92_v5, %v91_v4  ;;  %v94_v9 = vld [vmem:[#allocation11 + $0x18] sm:$0xff]  ;;  %v95_v12 = vld [vmem:[#allocation11 + $0x20] sm:$0xff]  ;;  %v96_v13 = vld [vmem:[#allocation11 + $0x28] sm:$0xff]  ;;  %p489_p10 = scmp.ne.s32.totalorder %s602_s5, %s488_s12  ;;  %p492_p11 = scmp.lt.u32.totalorder %s488_s12, %s602_s5 }
  0x39   :  { %v72_v10 = vmul.f32 1.442695, %v71_v6  ;;  %v380_v11 = vpack.c.bf16 %v94_v9, %v93_v8  ;;  %v383_v14 = vpack.c.bf16 %v96_v13, %v95_v12  ;;  %v97_v15 = vld [vmem:[#allocation11 + $0x30] sm:$0xff]  ;;  %v98_v16 = vld [vmem:[#allocation11 + $0x38] sm:$0xff]  ;;  %v99_v18 = vld [vmem:[#allocation11 + $0x40] sm:$0xff] }
  0x3a   :  { %378 = vmatpush3.bf16.msra.mxu1 %v377_v7  ;;  %v386_v17 = vpack.c.bf16 %v98_v16, %v97_v15  ;;  %v100_v19 = vld [vmem:[#allocation11 + $0x48] sm:$0xff]  ;;  %v101_v22 = vld [vmem:[#allocation11 + $0x50] sm:$0xff]  ;;  %v102_v23 = vld [vmem:[#allocation11 + $0x58] sm:$0xff]  ;;  %p494_p12 = pnand %p492_p11, %p489_p10 }
  0x3b   :  { %379 = vmatprep.subr.bf16.mxu1 %v509_v0  ;;  %416 = vpow2.f32 %v72_v10  ;;  %v389_v21 = vpack.c.bf16 %v100_v19, %v99_v18  ;;  %v392_v24 = vpack.c.bf16 %v102_v23, %v101_v22  ;;  %v103_v25 = vld [vmem:[#allocation11 + $0x60] sm:$0xff]  ;;  %v104_v26 = vld [vmem:[#allocation11 + $0x68] sm:$0xff]  ;;  %v105_v28 = vld [vmem:[#allocation11 + $0x70] sm:$0xff] }
  0x3c   :  { %v395_v27 = vpack.c.bf16 %v104_v26, %v103_v25  ;;  %v106_v29 = vld [vmem:[#allocation11 + $0x78] sm:$0xff]  ;;  %v177_v31 = vld [vmem:[%s600_s3] sm:$0xff] }
  0x3d   :  { %v398_v30 = vpack.c.bf16 %v106_v29, %v105_v28  ;;  %v68_v35 = vld [vmem:[#allocation9] sm:$0xff] }
  0x3e   :  { %381 = vmatpush3.bf16.msra.mxu1 %v380_v11  ;;  %vm259_vm2 = vcmp.ne.f32.partialorder %v68_v35, 0.0 }
  0x3f   :  { %382 = vmatprep.subr.bf16.mxu1 %v509_v0  ;;  %v316_v36 = vsel %vm259_vm2, 1.0, %v511_v1 }
  0x40   :  { %285 = vadd.xlane.f32.xlu1 %v316_v36 }
  0x42   :  { %384 = vmatpush3.bf16.msra.mxu1 %v383_v14 }
  0x43   :  { %385 = vmatprep.subr.bf16.mxu1 %v509_v0 }
  0x45   :  { %v417_v20 = vpop.eup %416 }
  0x46   :  { %387 = vmatpush3.bf16.msra.mxu1 %v386_v17  ;;  %74 = vadd.xlane.f32.xlu0 %v417_v20 }
  0x47   :  { %388 = vmatprep.subr.bf16.mxu1 %v509_v0 }
  0x4a   :  { %390 = vmatpush3.bf16.msra.mxu1 %v389_v21 }
  0x4b   :  { %391 = vmatprep.subr.bf16.mxu1 %v509_v0 }
  0x4e   :  { %393 = vmatpush3.bf16.msra.mxu1 %v392_v24 }
  0x4f   :  { %394 = vmatprep.subr.bf16.mxu1 %v509_v0 }
  0x52   :  { %396 = vmatpush3.bf16.msra.mxu1 %v395_v27 }
  0x53   :  { %397 = vmatprep.subr.bf16.mxu1 %v509_v0 }
  0x56   :  { %399 = vmatpush3.bf16.msra.mxu1 %v398_v30 }
  0x59   :  { %369 = vmatmul.mubr.f32.vlgmr.msra.gmra.mrb[0].mxu1 %v417_v20 }
  0xcd   :  { %v286_v44 = vpop.xlane.xlu1 %285 }
  0xce   :  { %v287_v45 = vrot.slane %v286_v44, 4 }
  0xd0   :  { %v288_v46 = vadd.f32 %v287_v45, %v286_v44 }
  0xd2   :  { %v289_v47 = vrot.slane %v288_v46, 2 }
  0xd3   :  { %v75_v32 = vpop.xlane.xlu0 %74 }
  0xd4   :  { %372 = vmatpush3.msra.mxu0 %v75_v32  ;;  %v290_v51 = vadd.f32 %v289_v47, %v288_v46 }
  0xd5   :  { %374 = vmatmul.mubr.msk.f32.vlgmr.msra.gmra.mrb[0].mxu0 %vm178_vm1, %v177_v31 }
  0xd6   :  { %v291_v54 = vrot.slane %v290_v51, 1 }
  0xd8   :  { %v292_v57 = vadd.f32 %v291_v54, %v290_v51 }
 0x12c   :  { %v173_v33 = vpop.f32.mrb[0].mxu1 }
 0x12d   :  { %v370_v34 = vpop.f32.mrb[1].mxu1 }
 0x1a8   :  { %v248_v37 = vpop.f32.mrb[0].mxu0 }
 0x1a9   :  { %v254_v38 = vadd.f32 %v248_v37, %v173_v33  ;;  %v375_v39 = vpop.f32.mrb[1].mxu0 }
 0x1ab   :  { %418 = vlog2.f32 %v254_v38 }
 0x1b5   :  { %v419_v40 = vpop.eup %418 }
 0x1b6   :  { %v256_v41 = vmul.f32 0.6931472, %v419_v40 }
 0x1b8   :  { %v257_v42 = vsub.f32 %v71_v6, %v256_v41 }
 0x1ba   :  { %v258_v43 = vmul.f32 %v257_v42, %v68_v35 }
 0x1bc   :  { %274 = vadd.xlane.f32.xlu0 %v258_v43 }
 0x249   :  { %v275_v48 = vpop.xlane.xlu0 %274 }
 0x24a   :  { %v276_v49 = vrot.slane %v275_v48, 4 }
 0x24c   :  { %v277_v50 = vadd.f32 %v276_v49, %v275_v48 }
 0x24e   :  { %v278_v52 = vrot.slane %v277_v50, 2 }
 0x250   :  { %v279_v53 = vadd.f32 %v278_v52, %v277_v50 }
 0x252   :  { %v280_v55 = vrot.slane %v279_v53, 1 }
 0x254   :  { %v281_v56 = vadd.f32 %v280_v55, %v279_v53 }
 0x256   :  { %401 = vpush %v281_v56 }
 0x257   :  { %403 = vpush %v292_v57 }
 0x287   :  { %s402_s3 = spop %401 }
 0x288   :  { %s404_s6 = spop %403  ;;  %s283_s7 = ssub.f32 0.0, %s402_s3 }
 0x289   :  { %v294_v58 = vstv %s404_s6 }
 0x28a   :  { %420 = vrcp.f32 %v294_v58 }
 0x294   :  { %v421_v59 = vpop.eup %420 }
 0x295   :  { %405 = vpush %v421_v59 }
 0x2c6   :  { %s406_s8 = spop %405 }
 0x2c7   :  { %s297_s9 = smul.f32 %s406_s8, %s283_s7 }
 0x2c9   :  { %299 = sst [smem:[#allocation12]] %s297_s9 }
 0x2ca   :  { %497 = shalt.err (!%p494_p12)
}
 0x2cb   :  { %s512_s16 = smov [#allocation12]  }
 0x2cc   :  { %307 = dma.smem_to_hbm %s512_s16, 16, %s602_s5, [#allocation8]  }
 0x2cd   :  { %502 = dma.done.wait [#allocation8], 16  }
 0x2ce   :  { %503 = vsyncadd [#allocation8], 4294967280 }
 0x2cf   :  { %311 = sfence }
 0x2d0   :  { %312 = vsyncpa [#allocation7], 1 }
 0x2d1   :  { %313 = vsyncpa [#allocation10], 1 }
 0x2d2   :  { %314 = vsyncpa [#allocation8], 1 }

</bundles_post_ra>
